<compile_context>
chip_gen: v7x
topology: tpu7x:2x2x1
jax: 0.10.0
libtpu: 0.0.40
codegen_flags: <defaults>
</compile_context>

<pallas_src>
import jax
import jax.numpy as jnp
from jax.experimental import pallas as pl
from jax.experimental.pallas import tpu as pltpu


def _round_up(x: int, m: int) -> int:
    return ((x + m - 1) // m) * m


def _critic_head_kernel(x_ref, w_ref, b_ref, out_ref):
    # x_ref: (tb, K) VMEM, w_ref: (n, K) VMEM, b_ref: (n,) SMEM,
    # out_ref: (n, tb) VMEM.  Contract K on both operands -> batch on lanes.
    acc = jax.lax.dot_general(
        w_ref[...], x_ref[...],
        dimension_numbers=(((1,), (1,)), ((), ())),
        preferred_element_type=jnp.float32,
    )  # (n, tb) f32
    n = out_ref.shape[0]
    for j in range(n):  # n is tiny & static (default 1 -> full-block store)
        out_ref[j:j + 1, :] = (acc[j:j + 1, :] + b_ref[j]).astype(out_ref.dtype)


def critic_head_forward(x, w, b):
    """CriticHead forward.

    x: [B, in_size]
    w: [n, in_size]   (torch Linear.weight layout, no transpose needed)
    b: [n]
    Returns: [B] if n == 1 (torch .squeeze(-1)), else [B, n].
    """
    B, in_size = x.shape
    n = w.shape[0]
    assert w.shape == (n, in_size)
    assert b.shape == (n,)

    x_item = jnp.dtype(x.dtype).itemsize
    w_item = jnp.dtype(w.dtype).itemsize

    # --- batch tile: lanes carry the batch axis ------------------------------
    if B <= 128:
        tb = B                                  # single exact block, no padding
    else:
        budget = 8 * 1024 * 1024                # conservative vs v5e 16 MiB scoped VMEM
        max_tb = max(128, (budget // (2 * in_size * x_item)) // 128 * 128)
        tb = min(2048, max_tb, _round_up(B, 128))
        if pl.cdiv(B, tb) < 2:                  # >= 2 steps -> both v7x TCs busy
            tb = max(128, _round_up(pl.cdiv(B, 2), 128))
    grid_b = pl.cdiv(B, tb)

    # --- VMEM accounting (x double-buffered + weight + out double-buffered) --
    vmem_need = 2 * tb * in_size * x_item + 2 * n * in_size * w_item + 2 * n * tb * x_item
    vmem_limit = None
    if vmem_need > 12 * 1024 * 1024:
        vmem_limit = min(128 * 1024 * 1024, int(vmem_need * 2))

    # --- true (unpadded) cost hint -------------------------------------------
    cost = pl.CostEstimate(
        flops=2 * B * in_size * n,
        transcendentals=0,
        bytes_accessed=(B * in_size * x_item + n * in_size * w_item
                        + n * 4 + B * n * x_item),
    )

    out_t = pl.pallas_call(
        _critic_head_kernel,
        out_shape=jax.ShapeDtypeStruct((n, B), x.dtype),
        grid_spec=pltpu.PrefetchScalarGridSpec(
            num_scalar_prefetch=0,
            grid=(grid_b,),
            in_specs=[
                pl.BlockSpec((tb, in_size), lambda i: (i, 0)),        # x tile
                pl.BlockSpec((n, in_size), lambda i: (0, 0)),          # weight (resident)
                pl.BlockSpec(memory_space=pltpu.MemorySpace.SMEM),     # bias scalars
            ],
            out_specs=pl.BlockSpec((n, tb), lambda i: (0, i)),
        ),
        compiler_params=pltpu.CompilerParams(
            dimension_semantics=("parallel",),
            vmem_limit_bytes=vmem_limit,
        ),
        cost_estimate=cost,
    )(x, w, b)

    if n == 1:
        return out_t[0]          # (B,)  == torch .squeeze(-1)
    return out_t.T               # (B, n), tiny transpose in the glue


def _orthogonal_linear_params(key, in_size, n, gain=1.0):
    # layer_init(nn.Linear(in_size, n), 1.0): orthogonal weight, zero bias.
    # TODO(synk): parameter initialization is host-side setup, not part of the
    # kernel'd forward pass.
    w = jax.nn.initializers.orthogonal(scale=gain)(key, (n, in_size), jnp.float32)
    b = jnp.zeros((n,), jnp.float32)
    return w, b


if __name__ == "__main__":
    key = jax.random.PRNGKey(0)
    k_x, k_w = jax.random.split(key)

    B, in_size, n = 8, 32, 1

    x = jax.random.normal(k_x, (B, in_size), jnp.float32)
    w, b = _orthogonal_linear_params(k_w, in_size, n, gain=1.0)

    out = jax.block_until_ready(critic_head_forward(x, w, b))

    # Reference check in plain JAX (matches torch Linear + squeeze(-1)).
    ref = (x @ w.T + b)[:, 0]
    assert out.shape == (B,)
    assert jnp.allclose(out, ref, atol=1e-5, rtol=1e-5)

    print("KERNEL_OK")
</pallas_src>

<mosaic_0001>
module attributes {stable_mosaic.version = 11 : i64} {
  func.func @_critic_head_kernel(%arg0: i32, %arg1: memref<8x32xf32, #tpu.memory_space<vmem>>, %arg2: memref<1x32xf32, #tpu.memory_space<vmem>>, %arg3: memref<1xf32, #tpu.memory_space<smem>>, %arg4: memref<1x8xf32, #tpu.memory_space<vmem>>) attributes {dimension_semantics = [#tpu.dimension_semantics<parallel>], iteration_bounds = array<i64: 1>, scalar_prefetch = 0 : i64, scratch_operands = 0 : i64, tpu.core_type = #tpu.core_type<tc>, window_params = [{transform_indices = @transform_0, window_bounds = array<i64: 8, 32>}, {pipeline_mode = #tpu.pipeline_mode<synchronous>, transform_indices = @transform_1, window_bounds = array<i64: 1, 32>}, {transform_indices = @transform_2, window_bounds = array<i64: 1>}, {transform_indices = @transform_3, window_bounds = array<i64: 1, 8>}]} {
    %c0 = arith.constant 0 : index
    %c0_0 = arith.constant 0 : index
    %0 = vector.load %arg2[%c0, %c0_0] : memref<1x32xf32, #tpu.memory_space<vmem>>, vector<1x32xf32>
    %c0_1 = arith.constant 0 : index
    %c0_2 = arith.constant 0 : index
    %1 = vector.load %arg1[%c0_1, %c0_2] : memref<8x32xf32, #tpu.memory_space<vmem>>, vector<8x32xf32>
    %cst = arith.constant dense<0.000000e+00> : vector<1x8xf32>
    %2 = tpu.matmul %0, %1, %cst {dimension_numbers = #tpu.dot_dimension_numbers<[1], [1], [0], [0], [0, 0, 1, 0], [], []>} : vector<1x32xf32>, vector<8x32xf32>, vector<1x8xf32> -> vector<1x8xf32>
    %c0_3 = arith.constant 0 : index
    %3 = memref.load %arg3[%c0_3] : memref<1xf32, #tpu.memory_space<smem>>
    %4 = vector.broadcast %3 : f32 to vector<1x8xf32>
    %5 = arith.addf %2, %4 : vector<1x8xf32>
    %c0_4 = arith.constant 0 : index
    %c0_5 = arith.constant 0 : index
    %6 = vector.load %arg4[%c0_4, %c0_5] : memref<1x8xf32, #tpu.memory_space<vmem>>, vector<1x8xf32>
    tpu.vector_store %arg4[%c0_4, %c0_5], %5 {strides = array<i32>} : memref<1x8xf32, #tpu.memory_space<vmem>>, vector<1x8xf32>,
    return
  }
  func.func @transform_0(%arg0: i32) -> (i32, i32) {
    %c0_i32 = arith.constant 0 : i32
    %c0_i32_0 = arith.constant 0 : i32
    return %arg0, %c0_i32 : i32, i32
  }
  func.func @transform_1(%arg0: i32) -> (i32, i32) {
    %c0_i32 = arith.constant 0 : i32
    %c0_i32_0 = arith.constant 0 : i32
    %c0_i32_1 = arith.constant 0 : i32
    return %c0_i32, %c0_i32_0 : i32, i32
  }
  func.func @transform_2(%arg0: i32) -> i32 {
    %c0_i32 = arith.constant 0 : i32
    %c0_i32_0 = arith.constant 0 : i32
    return %c0_i32 : i32
  }
  func.func @transform_3(%arg0: i32) -> (i32, i32) {
    %c0_i32 = arith.constant 0 : i32
    %c0_i32_0 = arith.constant 0 : i32
    return %c0_i32, %arg0 : i32, i32
  }
}

</mosaic_0001>

<bundles_post_ra>
// kernel: tpu_custom_call.1
= control target key start
LH: loop header
LB: loop body
LE: loop exit
PB: predicated region body
PF: predicated region fallthrough
CT: control target
= control target key end

     0   :  { %9 = vsyncpa [#allocation4], 0  ;;  %s241_s0 = inlined_call_operand.hbm [shape: f32[8,32], index: 0, kind: input, shape index: {}]   ;;  %s242_s1 = inlined_call_operand.vmem [shape: f32[1,32], index: 1, kind: input, shape index: {}]   ;;  %s243_s2 = inlined_call_operand.<no memory space> [shape: f32[1], index: 2, kind: input, shape index: {}]   ;;  %s244_s3 = inlined_call_operand.hbm [shape: f32[1,8], index: 3, kind: output, shape index: {}]  }
   0x1   :  { %10 = vsyncpa [#allocation5], 0  ;;  %s187_s12 = smov [#allocation3]   ;;  %s139_s16 = scalar_lea.hbm %s241_s0, 128 }
   0x2   :  { %s17_s13 = sshll.u32 %s187_s12, 4  ;;  %p140_p0 = scmp.ne.s32.totalorder %s241_s0, %s139_s16  ;;  %s18_s13 = int_to_ptr.vmem [resolvable:$true] %s17_s13 }
   0x3   :  { %p143_p1 = scmp.lt.u32.totalorder %s139_s16, %s241_s0 }
   0x5   :  { %p145_p2 = pnand %p143_p1, %p140_p0 }
   0x7   :  { %148 = shalt.err (!%p145_p2)
}
   0x8   :  { %s149_s21 = scalar_lea.vmem %s18_s13, 128  ;;  %p154_p4 = scmp.lt.s32.totalorder %s18_s13, %s18_s13 }
   0x9   :  { %p150_p3 = scmp.ne.s32.totalorder %s18_s13, %s149_s21  ;;  %p155_p5 = scmp.lt.s32.totalorder %s149_s21, %s149_s21 }
   0xb   :  { %p156_p6 = por %p155_p5, %p154_p4 }
   0xd   :  { %p157_p7 = pnand %p156_p6, %p150_p3 }
   0xf   :  { %160 = shalt.err (!%p157_p7)
}
  0x10   :  { %20 = dma.hbm_to_vmem [thread:$0]  %s241_s0, 128, %s18_s13, [#allocation4]  }
  0x11   :  { %183 = dma.done.wait [#allocation4], 128  }
  0x12   :  { %184 = vsyncadd [#allocation4], 4294967168  ;;  %v188_v0 = vmov 0.0   ;;  %vm189_vm0 = vmmov 0   ;;  %vm32_vm1 = vcmask 261120   ;;  %v29_v1 = vld [vmem:[#allocation3] sm:$0xff]  ;;  %v31_v3 = vstv %s243_s2 }
  0x13   :  { %130 = vmatprep.subr.mxu0 %v188_v0  ;;  %132 = vmatprep.mubr.msk.f32.mxu0 %vm189_vm0, %v188_v0  ;;  %v28_v2 = vld [vmem:[%s242_s1] sm:$0x1]  ;;  %s190_s28 = smov [#allocation6]   ;;  %vm109_vm2 = vcmask 57344  }
  0x14   :  { %131 = vmatpush3.xpose.msk.msra.mxu0 %vm32_vm1, %v29_v1  ;;  %s117_s0 = sshll.u32 %s190_s28, 4  ;;  %s118_s0 = int_to_ptr.vmem [resolvable:$true] %s117_s0 }
  0x15   :  { %s161_s29 = scalar_lea.vmem %s118_s0, 16  ;;  %s165_s30 = scalar_lea.vmem %s118_s0, 32 }
  0x16   :  { %p162_p8 = scmp.ne.s32.totalorder %s118_s0, %s161_s29  ;;  %p166_p9 = scmp.lt.s32.totalorder %s118_s0, %s118_s0 }
  0x17   :  { %133 = vmatmul.mubr.msk.f32.vlgmr.msra.gmra.mrb[0].mxu0 %vm32_vm1, %v28_v2  ;;  %p167_p10 = scmp.lt.s32.totalorder %s165_s30, %s161_s29 }
  0x19   :  { %p168_p11 = por %p167_p10, %p166_p9 }
  0x1b   :  { %p169_p12 = pnand %p168_p11, %p162_p8 }
  0xea   :  { %v105_v4 = vpop.f32.mrb[0].mxu0 }
  0xeb   :  { %v106_v5 = vadd.f32 %v105_v4, %v31_v3  ;;  %v134_v6 = vpop.f32.mrb[1].mxu0 }
  0xed   :  { %110 = vst.msk [vmem:[#allocation6] sm:$0x1] %vm109_vm2, %v106_v5 }
  0xee   :  { %172 = shalt.err (!%p169_p12)
}
  0xef   :  { %s173_s2 = scalar_lea.hbm %s244_s3, 16 }
  0xf0   :  { %p174_p13 = scmp.ne.s32.totalorder %s244_s3, %s173_s2  ;;  %p177_p0 = scmp.lt.u32.totalorder %s173_s2, %s244_s3 }
  0xf2   :  { %p179_p1 = pnand %p177_p0, %p174_p13 }
  0xf4   :  { %182 = shalt.err (!%p179_p1)
}
  0xf5   :  { %120 = dma.vmem_to_hbm [thread:$0]  %s118_s0, 16, %s244_s3, [#allocation5]  }
  0xf6   :  { %185 = dma.done.wait [#allocation5], 16  }
  0xf7   :  { %186 = vsyncadd [#allocation5], 4294967280 }
  0xf8   :  { %124 = vsyncpa [#allocation4], 1 }
  0xf9   :  { %125 = vsyncpa [#allocation5], 1 }

</bundles_post_ra>
